<compile_context>
chip_gen: v5e
topology: v5e:2x2
jax: 0.10.0
libtpu: 0.0.40
codegen_flags: <defaults>
</compile_context>

<pallas_src>
import math

import jax
import jax.numpy as jnp
from jax.experimental import pallas as pl
from jax.experimental.pallas import tpu as pltpu


_C1 = math.sqrt(2.0 / math.pi)          # sqrt(2/pi)
_C2 = _C1 * 0.044715                    # sqrt(2/pi) * 0.044715


def _cdiv(a, b):
    return -(-a // b)


def _gelu_kernel(x_ref, o_ref):
    # Load in storage dtype, compute in f32, store back in storage dtype.
    x = x_ref[...].astype(jnp.float32)
    half_x = 0.5 * x
    # 0.5*x*(1 + tanh(sqrt(2/pi)*(x + 0.044715*x^3)))
    #   == 0.5*x + 0.5*x * tanh(x * (C1 + C2*x*x))       (fewer VALU ops)
    inner = x * (_C1 + _C2 * (x * x))
    o_ref[...] = (half_x + half_x * jnp.tanh(inner)).astype(o_ref.dtype)


def gelu(x):
    """Tanh-approx GELU matching the PyTorch module (same shape & dtype)."""
    orig_shape = x.shape
    orig_dtype = x.dtype
    n = x.size
    if n == 0:
        return x

    itemsize = jnp.dtype(orig_dtype).itemsize
    # Sublane multiple for the second-to-last dim: 8 f32 / 16 bf16 / 32 int8.
    sub = max(8, 32 // itemsize)

    # ---- lane-dense layout: flatten and fold into (rows, L), L % 128 == 0 ----
    max_lane = 2048
    if n >= sub * max_lane:
        lane = max_lane
    else:
        lane = min(max_lane, 128 * _cdiv(n, 128))
    rows = _cdiv(n, lane)
    rows = _cdiv(rows, sub) * sub                 # sublane-align the row count
    padded = rows * lane

    flat = x.reshape(-1)
    if padded != n:
        flat = jnp.pad(flat, (0, padded - n))     # GELU(0) == 0, pad is harmless
    x2 = flat.reshape(rows, lane)

    # ---- VMEM-budget- and generation-aware tile size ----
    try:
        vmem_cap = pltpu.get_tpu_info().vmem_capacity_bytes
    except Exception:
        vmem_cap = 64 * 1024 * 1024               # conservative: v7x physical VMEM
    vmem_limit = int(vmem_cap * 0.75)             # ~48 MiB v7x / ~96 MiB v5e/v6e

    # Target ~4 MiB per input tile; double-buffered in+out => ~16 MiB resident,
    # well under the limit on every generation.
    target_block_bytes = min(4 * 1024 * 1024, vmem_limit // 8)
    block_rows = max(sub, (target_block_bytes // (lane * itemsize)) // sub * sub)
    block_rows = min(block_rows, rows)

    # Prefer >=2 grid steps when the array is big enough (v7x has 2 TCs).
    if block_rows >= rows and rows >= 2 * sub:
        block_rows = _cdiv(_cdiv(rows, 2), sub) * sub

    grid = (_cdiv(rows, block_rows),)

    out = pl.pallas_call(
        _gelu_kernel,
        out_shape=jax.ShapeDtypeStruct((rows, lane), orig_dtype),
        grid=grid,
        in_specs=[pl.BlockSpec((block_rows, lane), lambda i: (i, 0))],
        out_specs=pl.BlockSpec((block_rows, lane), lambda i: (i, 0)),
        compiler_params=pltpu.CompilerParams(
            dimension_semantics=("parallel",),
            vmem_limit_bytes=vmem_limit,
        ),
    )(x2)

    out_flat = out.reshape(-1)
    if padded != n:
        out_flat = out_flat[:n]
    return out_flat.reshape(orig_shape)


def _ref_gelu(x):
    xf = x.astype(jnp.float32)
    return (0.5 * xf * (1.0 + jnp.tanh(jnp.sqrt(2.0 / jnp.pi)
                                       * (xf + 0.044715 * xf ** 3)))).astype(x.dtype)


if __name__ == "__main__":
    key = jax.random.PRNGKey(0)

    # Small transformer-ish activation: batch=2, seq=8, hidden=32 (narrow
    # hidden -> exercises the lane-dense repacking path).
    x = jax.random.normal(key, (2, 8, 32), dtype=jnp.float32)
    y = gelu(x)
    jax.block_until_ready(y)
    ref = 0.5 * x * (1.0 + jnp.tanh(jnp.sqrt(2.0 / jnp.pi) * (x + 0.044715 * x ** 3)))
    assert y.shape == x.shape and y.dtype == x.dtype
    assert jnp.allclose(y, ref, atol=1e-6, rtol=1e-6)

    # Ragged f32 shape: exercises padding + multi-row tiling + tail block.
    k1, k2 = jax.random.split(key)
    x2 = jax.random.normal(k1, (3, 50, 7), dtype=jnp.float32)
    y2 = gelu(x2)
    jax.block_until_ready(y2)
    assert y2.shape == x2.shape and y2.dtype == x2.dtype
    assert jnp.allclose(y2, _ref_gelu(x2), atol=1e-6, rtol=1e-6)

    # bf16 I/O: storage dtype through HBM, f32 math inside the kernel.
    x3 = jax.random.normal(k2, (16, 96), dtype=jnp.bfloat16)
    y3 = gelu(x3)
    jax.block_until_ready(y3)
    assert y3.shape == x3.shape and y3.dtype == x3.dtype
    assert jnp.allclose(y3.astype(jnp.float32), _ref_gelu(x3).astype(jnp.float32),
                        atol=2e-2, rtol=2e-2)

    print("KERNEL_OK")
</pallas_src>

<mosaic_0001>
module attributes {stable_mosaic.version = 11 : i64} {
  func.func @_gelu_kernel(%arg0: i32, %arg1: memref<8x512xf32, #tpu.memory_space<vmem>>, %arg2: memref<8x512xf32, #tpu.memory_space<vmem>>) attributes {dimension_semantics = [#tpu.dimension_semantics<parallel>], iteration_bounds = array<i64: 1>, scalar_prefetch = 0 : i64, scratch_operands = 0 : i64, tpu.core_type = #tpu.core_type<tc>, window_params = [{transform_indices = @transform_0, window_bounds = array<i64: 8, 512>}, {transform_indices = @transform_1, window_bounds = array<i64: 8, 512>}]} {
    %c0 = arith.constant 0 : index
    %c0_0 = arith.constant 0 : index
    %0 = vector.load %arg1[%c0, %c0_0] : memref<8x512xf32, #tpu.memory_space<vmem>>, vector<8x512xf32>
    %cst = arith.constant 5.000000e-01 : f32
    %1 = vector.broadcast %cst : f32 to vector<8x512xf32>
    %2 = arith.mulf %1, %0 : vector<8x512xf32>
    %3 = arith.mulf %0, %0 : vector<8x512xf32>
    %cst_1 = arith.constant 0.0356774069 : f32
    %4 = vector.broadcast %cst_1 : f32 to vector<8x512xf32>
    %5 = arith.mulf %4, %3 : vector<8x512xf32>
    %cst_2 = arith.constant 0.797884583 : f32
    %6 = vector.broadcast %cst_2 : f32 to vector<8x512xf32>
    %7 = arith.addf %6, %5 : vector<8x512xf32>
    %8 = arith.mulf %0, %7 : vector<8x512xf32>
    %9 = math.tanh %8 : vector<8x512xf32>
    %10 = arith.mulf %2, %9 : vector<8x512xf32>
    %11 = arith.addf %2, %10 : vector<8x512xf32>
    %c0_3 = arith.constant 0 : index
    %c0_4 = arith.constant 0 : index
    %12 = vector.load %arg2[%c0_3, %c0_4] : memref<8x512xf32, #tpu.memory_space<vmem>>, vector<8x512xf32>
    tpu.vector_store %arg2[%c0_3, %c0_4], %11 {strides = array<i32>} : memref<8x512xf32, #tpu.memory_space<vmem>>, vector<8x512xf32>,
    return
  }
  func.func @transform_0(%arg0: i32) -> (i32, i32) {
    %c0_i32 = arith.constant 0 : i32
    %c0_i32_0 = arith.constant 0 : i32
    return %arg0, %c0_i32 : i32, i32
  }
  func.func @transform_1(%arg0: i32) -> (i32, i32) {
    %c0_i32 = arith.constant 0 : i32
    %c0_i32_0 = arith.constant 0 : i32
    return %arg0, %c0_i32 : i32, i32
  }
}

</mosaic_0001>

<bundles_post_ra>
// kernel: tpu_custom_call.1
= control target key start
LH: loop header
LB: loop body
LE: loop exit
PB: predicated region body
PF: predicated region fallthrough
CT: control target
= control target key end

     0   :  { %6 = vsyncpa [#allocation3], 0  ;;  %s160_s0 = inlined_call_operand.hbm [shape: f32[8,512], index: 0, kind: input, shape index: {}]   ;;  %s161_s1 = inlined_call_operand.hbm [shape: f32[8,512], index: 1, kind: output, shape index: {}]  }
   0x1   :  { %7 = vsyncpa [#allocation4], 0  ;;  %s13_s8 = sshll.u32 %s160_s0, 4  ;;  %s142_s9 = smov [#allocation2]   ;;  %s14_s8 = int_to_ptr.hbm [resolvable:$true] %s13_s8 }
   0x2   :  { %s15_s10 = sshll.u32 %s142_s9, 4  ;;  %s16_s10 = int_to_ptr.vmem [resolvable:$true] %s15_s10 }
   0x3   :  { %18 = dma.hbm_to_vmem [thread:$0]  %s14_s8, 512, %s16_s10, [#allocation3]  }
   0x4   :  { %138 = dma.done.wait [#allocation3], 512  }
   0x5   :  { %139 = vsyncadd [#allocation3], 4294966784  ;;  %v23_v0 = vld [vmem:[#allocation2] sm:$0xff]  ;;  %v24_v1 = vld [vmem:[#allocation2 + $0x8] sm:$0xff]  ;;  %s143_s0 = smov [#allocation5]   ;;  %s70_s14 = sshll.u32 %s161_s1, 4  ;;  %s71_s14 = int_to_ptr.hbm [resolvable:$true] %s70_s14 }
   0x6   :  { %v25_v2 = vld [vmem:[#allocation2 + $0x10] sm:$0xff]  ;;  %v31_v3 = vmul.f32 %v23_v0, %v23_v0  ;;  %v32_v4 = vmul.f32 %v24_v1, %v24_v1  ;;  %v26_v5 = vld [vmem:[#allocation2 + $0x18] sm:$0xff]  ;;  %v27_v20 = vmul.f32 0.5, %v23_v0  ;;  %v28_v21 = vmul.f32 0.5, %v24_v1  ;;  %s68_s11 = sshll.u32 %s143_s0, 4  ;;  %s69_s11 = int_to_ptr.vmem [resolvable:$true] %s68_s11 }
   0x7   :  { %v33_v6 = vmul.f32 %v25_v2, %v25_v2  ;;  %v34_v7 = vmul.f32 %v26_v5, %v26_v5  ;;  %v29_v22 = vmul.f32 0.5, %v25_v2  ;;  %v30_v24 = vmul.f32 0.5, %v26_v5 }
   0x8   :  { %v35_v8 = vmul.f32 0.035677407, %v31_v3  ;;  %v36_v9 = vmul.f32 0.035677407, %v32_v4 }
   0x9   :  { %v37_v10 = vmul.f32 0.035677407, %v33_v6  ;;  %v38_v11 = vmul.f32 0.035677407, %v34_v7 }
   0xa   :  { %v39_v12 = vadd.f32 0.7978846, %v35_v8  ;;  %v40_v13 = vadd.f32 0.7978846, %v36_v9 }
   0xb   :  { %v41_v14 = vadd.f32 0.7978846, %v37_v10  ;;  %v42_v15 = vadd.f32 0.7978846, %v38_v11 }
   0xc   :  { %v43_v16 = vmul.f32 %v39_v12, %v23_v0  ;;  %v44_v17 = vmul.f32 %v40_v13, %v24_v1 }
   0xd   :  { %v45_v18 = vmul.f32 %v41_v14, %v25_v2  ;;  %v46_v19 = vmul.f32 %v42_v15, %v26_v5 }
   0xe   :  { %82 = vtanh.f32 %v43_v16 }
   0xf   :  { %84 = vtanh.f32 %v44_v17 }
  0x10   :  { %86 = vtanh.f32 %v45_v18 }
  0x11   :  { %88 = vtanh.f32 %v46_v19 }
  0x14   :  { %v83_v23 = vpop.eup %82 }
  0x15   :  { %v85_v25 = vpop.eup %84  ;;  %v51_v26 = vmul.f32 %v83_v23, %v27_v20 }
  0x16   :  { %v87_v27 = vpop.eup %86  ;;  %v52_v28 = vmul.f32 %v85_v25, %v28_v21 }
  0x17   :  { %v89_v29 = vpop.eup %88  ;;  %v55_v30 = vadd.f32 %v51_v26, %v27_v20  ;;  %v53_v31 = vmul.f32 %v87_v27, %v29_v22 }
  0x18   :  { %v56_v32 = vadd.f32 %v52_v28, %v28_v21  ;;  %v54_v33 = vmul.f32 %v89_v29, %v30_v24 }
  0x19   :  { %59 = vst [vmem:[#allocation5] sm:$0xff] %v55_v30  ;;  %v57_v34 = vadd.f32 %v53_v31, %v29_v22 }
  0x1a   :  { %60 = vst [vmem:[#allocation5 + $0x8] sm:$0xff] %v56_v32  ;;  %v58_v35 = vadd.f32 %v54_v33, %v30_v24 }
  0x1b   :  { %61 = vst [vmem:[#allocation5 + $0x10] sm:$0xff] %v57_v34 }
  0x1c   :  { %62 = vst [vmem:[#allocation5 + $0x18] sm:$0xff] %v58_v35 }
  0x1d   :  { %73 = dma.vmem_to_hbm [thread:$0]  %s69_s11, 512, %s71_s14, [#allocation4]  }
  0x1e   :  { %140 = dma.done.wait [#allocation4], 512  }
  0x1f   :  { %141 = vsyncadd [#allocation4], 4294966784 }
  0x20   :  { %78 = vsyncpa [#allocation3], 1 }
  0x21   :  { %79 = vsyncpa [#allocation4], 1 }

</bundles_post_ra>
